<compile_context>
chip_gen: v5e
topology: v5e:2x2
jax: 0.10.0
libtpu: 0.0.40
codegen_flags: <defaults>
</compile_context>

<pallas_src>
import numpy as np
import jax
import jax.numpy as jnp
from jax.experimental import pallas as pl
from jax.experimental.pallas import tpu as pltpu


# --------------------------------------------------------------------------
# Kernel: zp_tile = z_tile @ Wz + bu_tile @ Wb   (both dots accumulate in f32)
# --------------------------------------------------------------------------
def _affine_coupling_kernel(z_ref, bu_ref, wz_ref, wb_ref, out_ref):
    acc = jnp.dot(z_ref[...], wz_ref[...], preferred_element_type=jnp.float32)
    acc = acc + jnp.dot(bu_ref[...], wb_ref[...],
                        preferred_element_type=jnp.float32)
    out_ref[...] = acc.astype(out_ref.dtype)


# --------------------------------------------------------------------------
# Parameter folding (done once, outside the hot path)
# --------------------------------------------------------------------------
def fold_affine_coupling_params(mask, params):
    """Fold the whole Affine_Coupling forward into two [D, D] matrices.

    forward(z, bu) == z @ Wz + bu @ Wb   (exact algebra; bias-free layers,
    no nonlinearities, static mask).
    """
    mask = np.asarray(mask)
    fix_idx = np.nonzero(mask)[0]
    change_idx = np.nonzero(1 - mask)[0]
    n_fix, n_change = len(fix_idx), len(change_idx)
    D = n_fix + n_change
    perm = np.concatenate([fix_idx, change_idx])      # original -> [fix|change]
    inv_perm = np.argsort(perm)

    f32 = jnp.float32
    # Right-multiply convention (y = x @ W.T), pre-transposed once here.
    T1t = jnp.transpose(params["T1"]).astype(f32)                       # [n_fix, n_fix]
    T2t = jnp.transpose(params["T2"]).astype(f32)                       # [n_chg, n_chg]
    # Fold the two bias-free Linear layers of each sub-net (exact).
    Wtnsl_t = jnp.transpose(params["tnsl_W1"] @ params["tnsl_W0"]).astype(f32)  # [n_chg, n_fix]
    Wcmpd_t = jnp.transpose(params["cmpd_W1"] @ params["cmpd_W0"]).astype(f32)  # [n_fix, n_chg]

    # In permuted order [fix | change]:
    #   v1 = z_p @ A1 + bu1
    #   v2 = z_p @ A2 + v1 @ Wcmpd_t + bu2
    A1 = jnp.concatenate([T1t, Wtnsl_t], axis=0)                        # [D, n_fix]
    A2 = jnp.concatenate(
        [jnp.zeros((n_fix, n_change), f32), T2t], axis=0)               # [D, n_chg]

    # Substitute v1 into v2:  out_p = [v1 | v2] = z_p @ B + bu_p @ C
    B = jnp.concatenate([A1, A2 + A1 @ Wcmpd_t], axis=1)                # [D, D]
    C_fix = jnp.concatenate(
        [jnp.eye(n_fix, dtype=f32), jnp.zeros((n_change, n_fix), f32)], axis=0)
    C_chg = jnp.concatenate(
        [Wcmpd_t, jnp.eye(n_change, dtype=f32)], axis=0)
    C = jnp.concatenate([C_fix, C_chg], axis=1)                         # [D, D]

    # Absorb the column gather (inputs) and scatter (output) into the weights:
    #   zp = z @ (P B P^T) + bu @ (P C P^T),  (P B P^T)[a,b] = B[inv[a], inv[b]]
    ix = np.ix_(inv_perm, inv_perm)
    Wz = B[ix]
    Wb = C[ix]
    return Wz, Wb


# --------------------------------------------------------------------------
# Forward wrapper
# --------------------------------------------------------------------------
def affine_coupling_forward(z, bu, Wz, Wb, *, batch_tile=None):
    """zp = z @ Wz + bu @ Wb, batch-tiled Pallas call."""
    Bsz, D = z.shape
    if batch_tile is None:
        # Full batch if small, else a sublane-aligned 256-row tile (biggest
        # that comfortably fits VMEM with double-buffered input streams even
        # on v7x's 64 MiB VMEM for realistic D).
        batch_tile = Bsz if Bsz <= 256 else 256
    # Keep the second-to-last (sublane) dim a multiple of 8 when tiling.
    if batch_tile != Bsz:
        batch_tile = max(8, (batch_tile // 8) * 8)
    grid = (pl.cdiv(Bsz, batch_tile),)

    act_spec = pl.BlockSpec((batch_tile, D), lambda i: (i, 0))
    w_spec = pl.BlockSpec((D, D), lambda i: (0, 0))   # weights stay VMEM-resident

    return pl.pallas_call(
        _affine_coupling_kernel,
        grid=grid,
        in_specs=[act_spec, act_spec, w_spec, w_spec],
        out_specs=act_spec,
        out_shape=jax.ShapeDtypeStruct((Bsz, D), z.dtype),
        compiler_params=pltpu.CompilerParams(
            dimension_semantics=("parallel",)),
    )(z, bu, Wz, Wb)


# --------------------------------------------------------------------------
# Pure-JAX reference (mirrors the PyTorch module, unfolded)
# --------------------------------------------------------------------------
def reference_forward(z, bu, mask, params):
    mask = np.asarray(mask)
    fix_idx = np.nonzero(mask)[0]
    change_idx = np.nonzero(1 - mask)[0]
    z1, z2 = z[:, fix_idx], z[:, change_idx]
    tnsl = (z2 @ params["tnsl_W0"].T) @ params["tnsl_W1"].T
    v1 = z1 @ params["T1"].T + tnsl + bu[:, fix_idx]
    cmpd = (v1 @ params["cmpd_W0"].T) @ params["cmpd_W1"].T
    v2 = z2 @ params["T2"].T + cmpd + bu[:, change_idx]
    zp = jnp.zeros_like(z)
    zp = zp.at[:, fix_idx].set(v1)
    zp = zp.at[:, change_idx].set(v2)
    return zp


if __name__ == "__main__":
    B = 8          # batch
    D = 8          # state dimension
    H = 32         # hidden width of tnsl / cmpd nets

    # alternating mask -> n_fix = n_change = 4
    mask = np.array([1, 0, 1, 0, 1, 0, 1, 0], dtype=np.int32)
    n_fix = int(mask.sum())
    n_change = D - n_fix

    key = jax.random.PRNGKey(0)
    k = jax.random.split(key, 7)
    params = {
        # init.eye_ on T1 / T2 (identity weights), nn.Linear [out, in] layout
        "T1": jnp.eye(n_fix, dtype=jnp.float32),
        "T2": jnp.eye(n_change, dtype=jnp.float32),
        "tnsl_W0": 0.1 * jax.random.normal(k[0], (H, n_change), jnp.float32),
        "tnsl_W1": 0.1 * jax.random.normal(k[1], (n_fix, H), jnp.float32),
        "cmpd_W0": 0.1 * jax.random.normal(k[2], (H, n_fix), jnp.float32),
        "cmpd_W1": 0.1 * jax.random.normal(k[3], (n_change, H), jnp.float32),
    }

    z = jax.random.normal(k[4], (B, D), jnp.float32)
    bu = jax.random.normal(k[5], (B, D), jnp.float32)

    # Fold once (weights + permutation + sub-net composition).
    Wz, Wb = fold_affine_coupling_params(mask, params)

    zp = affine_coupling_forward(z, bu, Wz, Wb)
    zp = jax.block_until_ready(zp)

    zp_ref = reference_forward(z, bu, mask, params)
    np.testing.assert_allclose(np.asarray(zp), np.asarray(zp_ref),
                               rtol=1e-5, atol=1e-5)
    print("KERNEL_OK")
</pallas_src>

<mosaic_0001>
module attributes {stable_mosaic.version = 11 : i64} {
  func.func @_affine_coupling_kernel(%arg0: i32, %arg1: memref<8x8xf32, #tpu.memory_space<vmem>>, %arg2: memref<8x8xf32, #tpu.memory_space<vmem>>, %arg3: memref<8x8xf32, #tpu.memory_space<vmem>>, %arg4: memref<8x8xf32, #tpu.memory_space<vmem>>, %arg5: memref<8x8xf32, #tpu.memory_space<vmem>>) attributes {dimension_semantics = [#tpu.dimension_semantics<parallel>], iteration_bounds = array<i64: 1>, scalar_prefetch = 0 : i64, scratch_operands = 0 : i64, tpu.core_type = #tpu.core_type<tc>, window_params = [{transform_indices = @transform_0, window_bounds = array<i64: 8, 8>}, {transform_indices = @transform_1, window_bounds = array<i64: 8, 8>}, {pipeline_mode = #tpu.pipeline_mode<synchronous>, transform_indices = @transform_2, window_bounds = array<i64: 8, 8>}, {pipeline_mode = #tpu.pipeline_mode<synchronous>, transform_indices = @transform_3, window_bounds = array<i64: 8, 8>}, {transform_indices = @transform_4, window_bounds = array<i64: 8, 8>}]} {
    %c0 = arith.constant 0 : index
    %c0_0 = arith.constant 0 : index
    %0 = vector.load %arg1[%c0, %c0_0] : memref<8x8xf32, #tpu.memory_space<vmem>>, vector<8x8xf32>
    %c0_1 = arith.constant 0 : index
    %c0_2 = arith.constant 0 : index
    %1 = vector.load %arg3[%c0_1, %c0_2] : memref<8x8xf32, #tpu.memory_space<vmem>>, vector<8x8xf32>
    %cst = arith.constant dense<0.000000e+00> : vector<8x8xf32>
    %2 = tpu.matmul %0, %1, %cst {dimension_numbers = #tpu.dot_dimension_numbers<[1], [0], [0], [1], [0, 0, 1, 1], [], []>} : vector<8x8xf32>, vector<8x8xf32>, vector<8x8xf32> -> vector<8x8xf32>
    %c0_3 = arith.constant 0 : index
    %c0_4 = arith.constant 0 : index
    %3 = vector.load %arg2[%c0_3, %c0_4] : memref<8x8xf32, #tpu.memory_space<vmem>>, vector<8x8xf32>
    %c0_5 = arith.constant 0 : index
    %c0_6 = arith.constant 0 : index
    %4 = vector.load %arg4[%c0_5, %c0_6] : memref<8x8xf32, #tpu.memory_space<vmem>>, vector<8x8xf32>
    %cst_7 = arith.constant dense<0.000000e+00> : vector<8x8xf32>
    %5 = tpu.matmul %3, %4, %cst_7 {dimension_numbers = #tpu.dot_dimension_numbers<[1], [0], [0], [1], [0, 0, 1, 1], [], []>} : vector<8x8xf32>, vector<8x8xf32>, vector<8x8xf32> -> vector<8x8xf32>
    %6 = arith.addf %2, %5 : vector<8x8xf32>
    %c0_8 = arith.constant 0 : index
    %c0_9 = arith.constant 0 : index
    %7 = vector.load %arg5[%c0_8, %c0_9] : memref<8x8xf32, #tpu.memory_space<vmem>>, vector<8x8xf32>
    tpu.vector_store %arg5[%c0_8, %c0_9], %6 {strides = array<i32>} : memref<8x8xf32, #tpu.memory_space<vmem>>, vector<8x8xf32>,
    return
  }
  func.func @transform_0(%arg0: i32) -> (i32, i32) {
    %c0_i32 = arith.constant 0 : i32
    %c0_i32_0 = arith.constant 0 : i32
    return %arg0, %c0_i32 : i32, i32
  }
  func.func @transform_1(%arg0: i32) -> (i32, i32) {
    %c0_i32 = arith.constant 0 : i32
    %c0_i32_0 = arith.constant 0 : i32
    return %arg0, %c0_i32 : i32, i32
  }
  func.func @transform_2(%arg0: i32) -> (i32, i32) {
    %c0_i32 = arith.constant 0 : i32
    %c0_i32_0 = arith.constant 0 : i32
    %c0_i32_1 = arith.constant 0 : i32
    return %c0_i32, %c0_i32_0 : i32, i32
  }
  func.func @transform_3(%arg0: i32) -> (i32, i32) {
    %c0_i32 = arith.constant 0 : i32
    %c0_i32_0 = arith.constant 0 : i32
    %c0_i32_1 = arith.constant 0 : i32
    return %c0_i32, %c0_i32_0 : i32, i32
  }
  func.func @transform_4(%arg0: i32) -> (i32, i32) {
    %c0_i32 = arith.constant 0 : i32
    %c0_i32_0 = arith.constant 0 : i32
    return %arg0, %c0_i32 : i32, i32
  }
}

</mosaic_0001>

<bundles_post_ra>
// kernel: tpu_custom_call.1
= control target key start
LH: loop header
LB: loop body
LE: loop exit
PB: predicated region body
PF: predicated region fallthrough
CT: control target
= control target key end

     0   :  { %9 = vsyncpa [#allocation3], 0  ;;  %s327_s0 = inlined_call_operand.hbm [shape: f32[8,8], index: 0, kind: input, shape index: {}]   ;;  %s328_s1 = inlined_call_operand.hbm [shape: f32[8,8], index: 1, kind: input, shape index: {}]   ;;  %s329_s2 = inlined_call_operand.hbm [shape: f32[8,8], index: 2, kind: input, shape index: {}]   ;;  %s330_s3 = inlined_call_operand.hbm [shape: f32[8,8], index: 3, kind: input, shape index: {}]   ;;  %s331_s4 = inlined_call_operand.hbm [shape: f32[8,8], index: 4, kind: output, shape index: {}]  }
   0x1   :  { %10 = vsyncpa [#allocation6], 0 }
   0x2   :  { %11 = vsyncpa [#allocation9], 0  ;;  %s29_s17 = sshll.u32 %s328_s1, 4  ;;  %s30_s17 = int_to_ptr.hbm [resolvable:$true] %s29_s17 }
   0x3   :  { %12 = vsyncpa [#allocation4], 0  ;;  %s279_s18 = smov [#allocation5]   ;;  %s18_s22 = sshll.u32 %s327_s0, 4  ;;  %s19_s22 = int_to_ptr.hbm [resolvable:$true] %s18_s22 }
   0x4   :  { %s31_s19 = sshll.u32 %s279_s18, 4  ;;  %s280_s23 = smov [#allocation2]   ;;  %s32_s19 = int_to_ptr.vmem [resolvable:$true] %s31_s19 }
   0x5   :  { %34 = dma.hbm_to_vmem [thread:$0]  %s30_s17, 128, %s32_s19, [#allocation6]  }
   0x6   :  { %s20_s24 = sshll.u32 %s280_s23, 4  ;;  %s40_s27 = sshll.u32 %s329_s2, 4  ;;  %s21_s24 = int_to_ptr.vmem [resolvable:$true] %s20_s24  ;;  %s41_s27 = int_to_ptr.hbm [resolvable:$true] %s40_s27 }
   0x7   :  { %23 = dma.hbm_to_vmem [thread:$0]  %s19_s22, 128, %s21_s24, [#allocation3]  }
   0x8   :  { %s51_s29 = sshll.u32 %s330_s3, 4  ;;  %s281_s30 = smov [#allocation7]   ;;  %s52_s29 = int_to_ptr.hbm [resolvable:$true] %s51_s29 }
   0x9   :  { %s42_s5 = sshll.u32 %s281_s30, 4  ;;  %s282_s0 = smov [#allocation8]   ;;  %s43_s5 = int_to_ptr.vmem [resolvable:$true] %s42_s5 }
   0xa   :  { %45 = dma.hbm_to_vmem [thread:$0]  %s41_s27, 128, %s43_s5, [#allocation6]  }
   0xb   :  { %s53_s6 = sshll.u32 %s282_s0, 4  ;;  %s54_s6 = int_to_ptr.vmem [resolvable:$true] %s53_s6 }
   0xc   :  { %56 = dma.hbm_to_vmem [thread:$0]  %s52_s29, 128, %s54_s6, [#allocation9]  }
   0xd   :  { %271 = dma.done.wait [#allocation3], 128  }
   0xe   :  { %272 = vsyncadd [#allocation3], 4294967168 }
   0xf   :  { %273 = dma.done.wait [#allocation6], 256  }
  0x10   :  { %274 = vsyncadd [#allocation6], 4294967040 }
  0x11   :  { %275 = dma.done.wait [#allocation9], 128  }
  0x12   :  { %276 = vsyncadd [#allocation9], 4294967168  ;;  %vm77_vm0 = vcmask 64512   ;;  %v76_v0 = vld [vmem:[#allocation8] sm:$0xff]  ;;  %v74_v1 = vld [vmem:[#allocation7] sm:$0xff]  ;;  %s283_s2 = smov [#allocation10]  }
  0x13   :  { %v75_v2 = vld [vmem:[#allocation5] sm:$0xff]  ;;  %96 = vmatpush.msra.mxu0 %v76_v0  ;;  %119 = vmatpush.msra.mxu1 %v74_v1  ;;  %v73_v3 = vld [vmem:[#allocation2] sm:$0xff]  ;;  %s130_s3 = sshll.u32 %s283_s2, 4  ;;  %s132_s9 = sshll.u32 %s331_s4, 4  ;;  %s131_s3 = int_to_ptr.vmem [resolvable:$true] %s130_s3  ;;  %s133_s9 = int_to_ptr.hbm [resolvable:$true] %s132_s9 }
  0x14   :  { %144 = vmatmul.msk.f32.vlgmr.msra.gmra.mxu0 %vm77_vm0, %v75_v2  ;;  %145 = vmatmul.msk.f32.vlgmr.msra.gmra.mxu1 %vm77_vm0, %v73_v3 }
  0x91   :  { %v98_v4 = vpop.f32.mrf.mxu0  ;;  %v121_v5 = vpop.f32.mrf.mxu1 }
  0x92   :  { %v122_v6 = vadd.f32 %v121_v5, %v98_v4 }
  0x94   :  { %124 = vst.msk [vmem:[#allocation10] sm:$0xff] %vm77_vm0, %v122_v6 }
  0x95   :  { %135 = dma.vmem_to_hbm [thread:$0]  %s131_s3, 128, %s133_s9, [#allocation4]  }
  0x96   :  { %277 = dma.done.wait [#allocation4], 128  }
  0x97   :  { %278 = vsyncadd [#allocation4], 4294967168 }
  0x98   :  { %140 = vsyncpa [#allocation3], 1 }
  0x99   :  { %141 = vsyncpa [#allocation6], 1 }
  0x9a   :  { %142 = vsyncpa [#allocation9], 1 }
  0x9b   :  { %143 = vsyncpa [#allocation4], 1 }

</bundles_post_ra>
